<compile_context>
chip_gen: v7x
topology: tpu7x:2x2x1
jax: 0.10.0
libtpu: 0.0.40
codegen_flags: <defaults>
</compile_context>

<pallas_src>
import jax
import jax.numpy as jnp
from jax.experimental import pallas as pl
from jax.experimental.pallas import tpu as pltpu


def _round_up(x, m):
    return ((x + m - 1) // m) * m


def linear_kernel(x_ref, w_ref, b_ref, o_ref):
    # x_ref: [tb, K], w_ref: [K, C] (pre-transposed), b_ref: [1, C],
    # o_ref: [tb, C]
    acc = jnp.dot(x_ref[...], w_ref[...], preferred_element_type=jnp.float32)
    o_ref[...] = (acc + b_ref[...]).astype(o_ref.dtype)


def prepare_params(weight, bias):
    """One-time parameter prep (do at init time, NOT per forward call).

    weight: [C, K] in PyTorch nn.Linear layout -> stored transposed [K, C]
            so every kernel step is a canonical [M,K] x [K,N] MXU matmul.
    bias:   [C] -> [1, C] for broadcast inside the kernel.

    No feature padding: output last dim stays exactly common_dim, halving
    output HBM bytes vs. padding to 128 and removing any post-kernel slice.
    # TODO(synk): on v5e (single vector-store slot) lane-dense 128-padded
    # stores may be preferable; if so pad here and consume the padded output
    # downstream instead of slicing.
    """
    w_t = jnp.asarray(weight).T              # [K, C], materialized once
    b = jnp.asarray(bias).reshape(1, -1)     # [1, C]
    return w_t, b


def mhd_label_processor(x, w_t, b, *, block_rows=2048, small_batch_threshold=0):
    """Forward of MHDLabelProcessor.

    Args:
      x:    [B, 10] float32
      w_t:  [10, C] float32 (from prepare_params; already transposed)
      b:    [1, C]  float32 (from prepare_params)
    Returns:
      [B, C] float32 == x @ W.T + bias
    """
    B, K = x.shape
    K_w, C = w_t.shape
    assert K == K_w, (K, K_w)

    if B <= small_batch_threshold:
        # Tiny batches: a single fused XLA dot beats kernel dispatch overhead.
        return x @ w_t + b

    # Batch tile: multiple of 8 sublanes, capped at block_rows, and chosen so
    # that any B > 8 yields >= 2 grid blocks (lets v7x shard across both TCs).
    tb = min(block_rows, max(8, _round_up(pl.cdiv(B, 2), 8)))
    grid = (pl.cdiv(B, tb),)   # ragged last tile handled by Pallas masking

    itemsize = jnp.dtype(x.dtype).itemsize
    cost = pl.CostEstimate(
        flops=2 * B * K * C,
        transcendentals=0,
        bytes_accessed=(B * K + K * C + C + B * C) * itemsize,
    )

    out = pl.pallas_call(
        linear_kernel,
        out_shape=jax.ShapeDtypeStruct((B, C), x.dtype),
        grid=grid,
        in_specs=[
            pl.BlockSpec((tb, K), lambda i: (i, 0)),   # x: tiled over batch
            pl.BlockSpec((K, C), lambda i: (0, 0)),    # weight: resident
            pl.BlockSpec((1, C), lambda i: (0, 0)),    # bias: resident
        ],
        out_specs=pl.BlockSpec((tb, C), lambda i: (i, 0)),
        compiler_params=pltpu.CompilerParams(
            dimension_semantics=("parallel",),         # shards across TCs on v7x
        ),
        cost_estimate=cost,
    )(x, w_t, b)
    return out


if __name__ == "__main__":
    common_dim = 64
    B = 8
    in_dim = 10

    key = jax.random.PRNGKey(0)
    kx, kw, kb = jax.random.split(key, 3)

    # Deterministic param init mimicking nn.Linear: U(-1/sqrt(fan_in), +)
    bound = 1.0 / jnp.sqrt(jnp.float32(in_dim))
    weight = jax.random.uniform(kw, (common_dim, in_dim), jnp.float32,
                                minval=-bound, maxval=bound)
    bias = jax.random.uniform(kb, (common_dim,), jnp.float32,
                              minval=-bound, maxval=bound)

    # Example input: label-like vectors (e.g. one-hot / soft labels), [B, 10]
    x = jax.random.uniform(kx, (B, in_dim), jnp.float32)

    # One-time param prep (transpose weight once; no per-call layout work).
    w_t, b_p = prepare_params(weight, bias)

    out = mhd_label_processor(x, w_t, b_p)
    out = jax.block_until_ready(out)

    # Reference check in plain JAX
    ref = x @ weight.T + bias
    assert out.shape == (B, common_dim)
    assert jnp.allclose(out, ref, atol=1e-5, rtol=1e-5), "mismatch vs reference"

    print("KERNEL_OK")
</pallas_src>

<mosaic_0001>
module attributes {stable_mosaic.version = 11 : i64} {
  func.func @linear_kernel(%arg0: i32, %arg1: memref<8x10xf32, #tpu.memory_space<vmem>>, %arg2: memref<10x64xf32, #tpu.memory_space<vmem>>, %arg3: memref<1x64xf32, #tpu.memory_space<vmem>>, %arg4: memref<8x64xf32, #tpu.memory_space<vmem>>) attributes {dimension_semantics = [#tpu.dimension_semantics<parallel>], iteration_bounds = array<i64: 1>, scalar_prefetch = 0 : i64, scratch_operands = 0 : i64, tpu.core_type = #tpu.core_type<tc>, window_params = [{transform_indices = @transform_0, window_bounds = array<i64: 8, 10>}, {pipeline_mode = #tpu.pipeline_mode<synchronous>, transform_indices = @transform_1, window_bounds = array<i64: 10, 64>}, {pipeline_mode = #tpu.pipeline_mode<synchronous>, transform_indices = @transform_2, window_bounds = array<i64: 1, 64>}, {transform_indices = @transform_3, window_bounds = array<i64: 8, 64>}]} {
    %c0 = arith.constant 0 : index
    %c0_0 = arith.constant 0 : index
    %0 = vector.load %arg1[%c0, %c0_0] : memref<8x10xf32, #tpu.memory_space<vmem>>, vector<8x10xf32>
    %c0_1 = arith.constant 0 : index
    %c0_2 = arith.constant 0 : index
    %1 = vector.load %arg2[%c0_1, %c0_2] : memref<10x64xf32, #tpu.memory_space<vmem>>, vector<10x64xf32>
    %cst = arith.constant dense<0.000000e+00> : vector<8x64xf32>
    %2 = tpu.matmul %0, %1, %cst {dimension_numbers = #tpu.dot_dimension_numbers<[1], [0], [0], [1], [0, 0, 1, 1], [], []>} : vector<8x10xf32>, vector<10x64xf32>, vector<8x64xf32> -> vector<8x64xf32>
    %c0_3 = arith.constant 0 : index
    %c0_4 = arith.constant 0 : index
    %3 = vector.load %arg3[%c0_3, %c0_4] : memref<1x64xf32, #tpu.memory_space<vmem>>, vector<1x64xf32>
    %4 = vector.broadcast %3 : vector<1x64xf32> to vector<8x64xf32>
    %5 = arith.addf %2, %4 : vector<8x64xf32>
    %c0_5 = arith.constant 0 : index
    %c0_6 = arith.constant 0 : index
    %6 = vector.load %arg4[%c0_5, %c0_6] : memref<8x64xf32, #tpu.memory_space<vmem>>, vector<8x64xf32>
    tpu.vector_store %arg4[%c0_5, %c0_6], %5 {strides = array<i32>} : memref<8x64xf32, #tpu.memory_space<vmem>>, vector<8x64xf32>,
    return
  }
  func.func @transform_0(%arg0: i32) -> (i32, i32) {
    %c0_i32 = arith.constant 0 : i32
    %c0_i32_0 = arith.constant 0 : i32
    return %arg0, %c0_i32 : i32, i32
  }
  func.func @transform_1(%arg0: i32) -> (i32, i32) {
    %c0_i32 = arith.constant 0 : i32
    %c0_i32_0 = arith.constant 0 : i32
    %c0_i32_1 = arith.constant 0 : i32
    return %c0_i32, %c0_i32_0 : i32, i32
  }
  func.func @transform_2(%arg0: i32) -> (i32, i32) {
    %c0_i32 = arith.constant 0 : i32
    %c0_i32_0 = arith.constant 0 : i32
    %c0_i32_1 = arith.constant 0 : i32
    return %c0_i32, %c0_i32_0 : i32, i32
  }
  func.func @transform_3(%arg0: i32) -> (i32, i32) {
    %c0_i32 = arith.constant 0 : i32
    %c0_i32_0 = arith.constant 0 : i32
    return %arg0, %c0_i32 : i32, i32
  }
}

</mosaic_0001>

<bundles_post_ra>
// kernel: tpu_custom_call.1
= control target key start
LH: loop header
LB: loop body
LE: loop exit
PB: predicated region body
PF: predicated region fallthrough
CT: control target
= control target key end

     0   :  { %8 = vsyncpa [#allocation3], 0  ;;  %s320_s0 = inlined_call_operand.hbm [shape: f32[8,10], index: 0, kind: input, shape index: {}]   ;;  %s321_s1 = inlined_call_operand.hbm [shape: f32[10,64], index: 1, kind: input, shape index: {}]   ;;  %s322_s2 = inlined_call_operand.vmem [shape: f32[1,64], index: 2, kind: input, shape index: {}]   ;;  %s323_s3 = inlined_call_operand.hbm [shape: f32[8,64], index: 3, kind: output, shape index: {}]  }
   0x1   :  { %9 = vsyncpa [#allocation6], 0 }
   0x2   :  { %10 = vsyncpa [#allocation4], 0  ;;  %s245_s12 = smov [#allocation2]   ;;  %s246_s14 = smov [#allocation5]  }
   0x3   :  { %s17_s13 = sshll.u32 %s245_s12, 4  ;;  %s26_s15 = sshll.u32 %s246_s14, 4  ;;  %s18_s13 = int_to_ptr.vmem [resolvable:$true] %s17_s13  ;;  %s274_s15 = int_to_ptr.vmem [resolvable:$true] %s26_s15 }
   0x4   :  { %s173_s18 = scalar_lea.hbm %s320_s0, 128 }
   0x5   :  { %p174_p0 = scmp.ne.s32.totalorder %s320_s0, %s173_s18  ;;  %p177_p1 = scmp.lt.u32.totalorder %s173_s18, %s320_s0 }
   0x7   :  { %p179_p2 = pnand %p177_p1, %p174_p0 }
   0x9   :  { %182 = shalt.err (!%p179_p2)
}
   0xa   :  { %s183_s23 = scalar_lea.vmem %s18_s13, 128  ;;  %p188_p4 = scmp.lt.s32.totalorder %s18_s13, %s18_s13 }
   0xb   :  { %p184_p3 = scmp.ne.s32.totalorder %s18_s13, %s183_s23  ;;  %p189_p5 = scmp.lt.s32.totalorder %s183_s23, %s183_s23 }
   0xd   :  { %p190_p6 = por %p189_p5, %p188_p4 }
   0xf   :  { %p191_p7 = pnand %p190_p6, %p184_p3 }
  0x11   :  { %194 = shalt.err (!%p191_p7)
}
  0x12   :  { %20 = dma.hbm_to_vmem [thread:$0]  %s320_s0, 128, %s18_s13, [#allocation3]  }
  0x13   :  { %s195_s28 = scalar_lea.hbm %s321_s1, 256 }
  0x14   :  { %p196_p8 = scmp.ne.s32.totalorder %s321_s1, %s195_s28  ;;  %p199_p9 = scmp.lt.u32.totalorder %s195_s28, %s321_s1 }
  0x16   :  { %p201_p10 = pnand %p199_p9, %p196_p8 }
  0x18   :  { %204 = shalt.err (!%p201_p10)
}
  0x19   :  { %s205_s6 = scalar_lea.vmem %s274_s15, 256  ;;  %p210_p12 = scmp.lt.s32.totalorder %s274_s15, %s274_s15 }
  0x1a   :  { %p206_p11 = scmp.ne.s32.totalorder %s274_s15, %s205_s6  ;;  %p211_p13 = scmp.lt.s32.totalorder %s205_s6, %s205_s6 }
  0x1c   :  { %p212_p0 = por %p211_p13, %p210_p12 }
  0x1e   :  { %p213_p1 = pnand %p212_p0, %p206_p11 }
  0x20   :  { %216 = shalt.err (!%p213_p1)
}
  0x21   :  { %s247_s0 = smov 128   ;;  %s248_s7 = smov 8  }
  0x22   :  { %32 = dma.hbm_to_vmem [thread:$0]  %s321_s1, 256, %s274_s15, [#allocation6], %s247_s0, %s247_s0, %s248_s7  }
  0x23   :  { %239 = dma.done.wait [#allocation3], 128  }
  0x24   :  { %240 = vsyncadd [#allocation3], 4294967168 }
  0x25   :  { %241 = dma.done.wait [#allocation6], 256  }
  0x26   :  { %242 = vsyncadd [#allocation6], 4294967040  ;;  %v249_v0 = vmov 0.0|0.0   ;;  %vm250_vm0 = vmmov 0   ;;  %v251_v1 = vmov 0.0   ;;  %vm55_vm1 = vcmask 1041408  }
  0x27   :  { %160 = vmatprep.subr.bf16.mxu0 %v249_v0  ;;  %157 = vmatprep.mubr.msk.f32.mxu0 %vm250_vm0, %v251_v1  ;;  %v42_v2 = vld [vmem:[#allocation5] sm:$0xff]  ;;  %v43_v3 = vld [vmem:[#allocation5 + $0x8] sm:$0x3]  ;;  %vm252_vm2 = vmmov 1   ;;  %v41_v5 = vld [vmem:[#allocation2] sm:$0xff]  ;;  %vm51_vm4 = vcmask 80896  }
  0x28   :  { %vm162_vm3 = vmpackc.low %vm55_vm1, %vm252_vm2  ;;  %v161_v4 = vpack.c.bf16 %v43_v3, %v42_v2  ;;  %v147_v6 = vld [vmem:[%s322_s2] ss:$0 sm:$0xff]  ;;  %s253_s11 = smov [#allocation7]   ;;  %vm129_vm5 = vcmask 523264  }
  0x29   :  { %s137_s12 = sshll.u32 %s253_s11, 4  ;;  %s138_s12 = int_to_ptr.vmem [resolvable:$true] %s137_s12 }
  0x2a   :  { %163 = vmatpush3.bf16.msk.msra.mxu0 %vm162_vm3, %v161_v4  ;;  %s217_s13 = scalar_lea.vmem %s138_s12, 128  ;;  %p222_p3 = scmp.lt.s32.totalorder %s138_s12, %s138_s12 }
  0x2b   :  { %p218_p2 = scmp.ne.s32.totalorder %s138_s12, %s217_s13  ;;  %p223_p4 = scmp.lt.s32.totalorder %s217_s13, %s217_s13 }
  0x2d   :  { %158 = vmatmul.mubr.msk.f32.vlgmr.msra.gmra.mrb[0].mxu0 %vm51_vm4, %v41_v5  ;;  %p224_p5 = por %p223_p4, %p222_p3 }
  0x2f   :  { %p225_p6 = pnand %p224_p5, %p218_p2 }
 0x100   :  { %v125_v7 = vpop.f32.mrb[0].mxu0 }
 0x101   :  { %v126_v8 = vadd.f32 %v147_v6, %v125_v7  ;;  %v159_v9 = vpop.f32.mrb[1].mxu0 }
 0x103   :  { %130 = vst.msk [vmem:[#allocation7] sm:$0xff] %vm129_vm5, %v126_v8 }
 0x104   :  { %228 = shalt.err (!%p225_p6)
}
 0x105   :  { %s229_s16 = scalar_lea.hbm %s323_s3, 128 }
 0x106   :  { %p230_p7 = scmp.ne.s32.totalorder %s323_s3, %s229_s16  ;;  %p233_p8 = scmp.lt.u32.totalorder %s229_s16, %s323_s3 }
 0x108   :  { %p235_p9 = pnand %p233_p8, %p230_p7 }
 0x10a   :  { %238 = shalt.err (!%p235_p9)
}
 0x10b   :  { %140 = dma.vmem_to_hbm [thread:$0]  %s138_s12, 128, %s323_s3, [#allocation4]  }
 0x10c   :  { %243 = dma.done.wait [#allocation4], 128  }
 0x10d   :  { %244 = vsyncadd [#allocation4], 4294967168 }
 0x10e   :  { %144 = vsyncpa [#allocation3], 1 }
 0x10f   :  { %145 = vsyncpa [#allocation6], 1 }
 0x110   :  { %146 = vsyncpa [#allocation4], 1 }

</bundles_post_ra>
